<compile_context>
chip_gen: v7x
topology: tpu7x:2x2x1
jax: 0.10.0
libtpu: 0.0.40
codegen_flags: <defaults>
</compile_context>

<pallas_src>
import functools

import jax
import jax.numpy as jnp
from jax.experimental import pallas as pl
from jax.experimental.pallas import tpu as pltpu


def _round_up(n, m):
    return ((n + m - 1) // m) * m


# -----------------------------------------------------------------------------
# Kernel
# -----------------------------------------------------------------------------
def mfsiren_kernel(x_ref, wt_ref, b_ref, o_ref):
    # x: [TB, Din]   wt: [Din, F*H]   b: [1, F*H]   o: [TB, F*H]
    z = jnp.dot(x_ref[...], wt_ref[...], preferred_element_type=jnp.float32)
    o_ref[...] = jnp.sin(z + b_ref[...]).astype(o_ref.dtype)


# -----------------------------------------------------------------------------
# One-time parameter preprocessing (hoisted out of the jitted forward)
# -----------------------------------------------------------------------------
def prepare_params(W, b, frequencies):
    """Fold the frequency expansion + omega scale into blocked weight/bias.

    W: [H, Din]  b: [H]  frequencies: tuple/list of floats (length F)
    Returns wt_blk [Din, F*H], b_blk [1, F*H] with column order f*H + h,
    matching torch.cat([sin(w_f * base) for w_f in frequencies], dim=-1).
    """
    freqs = jnp.asarray(frequencies, dtype=jnp.float32)               # [F]
    H, Din = W.shape
    F = freqs.shape[0]
    wt_blk = freqs[:, None, None] * W.T[None, :, :]                   # [F, Din, H]
    wt_blk = jnp.transpose(wt_blk, (1, 0, 2)).reshape(Din, F * H)     # [Din, F*H]
    b_blk = (freqs[:, None] * b[None, :]).reshape(1, F * H)           # [1, F*H]
    return wt_blk, b_blk


# -----------------------------------------------------------------------------
# Forward (Pallas)
# -----------------------------------------------------------------------------
def multi_freq_siren_forward(x, wt_blk, b_blk, *, block_b=2048):
    """x: [B, Din], wt_blk: [Din, N], b_blk: [1, N]  ->  [B, N], N = F*H."""
    B, Din = x.shape
    N = wt_blk.shape[1]

    # Batch tile: multiple of 8 sublanes, capped per-generation-safe default
    # (block_b=2048 keeps double-buffered in/out tiles ~1 MiB << 64 MiB v7x VMEM).
    TB = min(block_b, _round_up(B, 8))
    Bp = _round_up(B, TB)
    if Bp != B:
        x = jnp.pad(x, ((0, Bp - B), (0, 0)))

    out = pl.pallas_call(
        mfsiren_kernel,
        out_shape=jax.ShapeDtypeStruct((Bp, N), jnp.float32),
        grid_spec=pltpu.PrefetchScalarGridSpec(
            num_scalar_prefetch=0,
            grid=(Bp // TB,),
            in_specs=[
                pl.BlockSpec((TB, Din), lambda i: (i, 0)),   # batch-tiled input
                pl.BlockSpec((Din, N), lambda i: (0, 0)),    # full (tiny) weights
                pl.BlockSpec((1, N), lambda i: (0, 0)),      # full bias row
            ],
            out_specs=pl.BlockSpec((TB, N), lambda i: (i, 0)),
        ),
        compiler_params=pltpu.CompilerParams(
            dimension_semantics=("parallel",),               # megacore on v7x
            vmem_limit_bytes=32 * 1024 * 1024,
        ),
    )(x, wt_blk, b_blk)

    return out[:B] if Bp != B else out


# -----------------------------------------------------------------------------
# Pure-JAX reference (mirrors the PyTorch forward exactly)
# -----------------------------------------------------------------------------
def multi_freq_siren_ref(x, W, b, frequencies):
    base = x @ W.T + b
    return jnp.concatenate([jnp.sin(f * base) for f in frequencies], axis=-1)


# -----------------------------------------------------------------------------
# Main
# -----------------------------------------------------------------------------
if __name__ == "__main__":
    B = 256
    in_features = 4
    out_features = 32                      # H
    frequencies = (1.0, 2.0, 4.0, 8.0)     # F = 4  ->  output width 128 (lane-dense)

    key = jax.random.PRNGKey(0)
    kx, kw, kb = jax.random.split(key, 3)
    x = jax.random.uniform(kx, (B, in_features), jnp.float32, -1.0, 1.0)

    # Weight init mirroring MultiFreqSIRENLayer(is_first=True):
    #   W ~ U(-1/in_features, 1/in_features); bias keeps nn.Linear default
    #   U(-1/sqrt(in_features), 1/sqrt(in_features)).
    w_bound = 1.0 / in_features
    W = jax.random.uniform(kw, (out_features, in_features), jnp.float32,
                           -w_bound, w_bound)
    b_bound = 1.0 / (in_features ** 0.5)
    b = jax.random.uniform(kb, (out_features,), jnp.float32, -b_bound, b_bound)

    # One-time parameter preprocessing (outside jit, per perf feedback).
    wt_blk, b_blk = prepare_params(W, b, frequencies)

    fwd = jax.jit(multi_freq_siren_forward, static_argnames=("block_b",))
    # Small demo tile so the batch grid actually has several steps (grid=(4,)).
    y = jax.block_until_ready(fwd(x, wt_blk, b_blk, block_b=64))

    y_ref = multi_freq_siren_ref(x, W, b, frequencies)
    assert y.shape == (B, out_features * len(frequencies)), y.shape
    assert jnp.allclose(y, y_ref, atol=1e-5, rtol=1e-5), (
        float(jnp.max(jnp.abs(y - y_ref))))

    print("KERNEL_OK")
</pallas_src>

<mosaic_0001>
module attributes {stable_mosaic.version = 11 : i64} {
  func.func @mfsiren_kernel(%arg0: i32, %arg1: memref<64x4xf32, #tpu.memory_space<vmem>>, %arg2: memref<4x128xf32, #tpu.memory_space<vmem>>, %arg3: memref<1x128xf32, #tpu.memory_space<vmem>>, %arg4: memref<64x128xf32, #tpu.memory_space<vmem>>) attributes {dimension_semantics = [#tpu.dimension_semantics<parallel>], iteration_bounds = array<i64: 4>, scalar_prefetch = 0 : i64, scratch_operands = 0 : i64, tpu.core_type = #tpu.core_type<tc>, window_params = [{transform_indices = @transform_0, window_bounds = array<i64: 64, 4>}, {pipeline_mode = #tpu.pipeline_mode<synchronous>, transform_indices = @transform_1, window_bounds = array<i64: 4, 128>}, {pipeline_mode = #tpu.pipeline_mode<synchronous>, transform_indices = @transform_2, window_bounds = array<i64: 1, 128>}, {transform_indices = @transform_3, window_bounds = array<i64: 64, 128>}]} {
    %c0 = arith.constant 0 : index
    %c0_0 = arith.constant 0 : index
    %0 = vector.load %arg1[%c0, %c0_0] : memref<64x4xf32, #tpu.memory_space<vmem>>, vector<64x4xf32>
    %c0_1 = arith.constant 0 : index
    %c0_2 = arith.constant 0 : index
    %1 = vector.load %arg2[%c0_1, %c0_2] : memref<4x128xf32, #tpu.memory_space<vmem>>, vector<4x128xf32>
    %cst = arith.constant dense<0.000000e+00> : vector<64x128xf32>
    %2 = tpu.matmul %0, %1, %cst {dimension_numbers = #tpu.dot_dimension_numbers<[1], [0], [0], [1], [0, 0, 1, 1], [], []>} : vector<64x4xf32>, vector<4x128xf32>, vector<64x128xf32> -> vector<64x128xf32>
    %c0_3 = arith.constant 0 : index
    %c0_4 = arith.constant 0 : index
    %3 = vector.load %arg3[%c0_3, %c0_4] : memref<1x128xf32, #tpu.memory_space<vmem>>, vector<1x128xf32>
    %4 = vector.broadcast %3 : vector<1x128xf32> to vector<64x128xf32>
    %5 = arith.addf %2, %4 : vector<64x128xf32>
    %6 = math.sin %5 : vector<64x128xf32>
    %c0_5 = arith.constant 0 : index
    %c0_6 = arith.constant 0 : index
    %7 = vector.load %arg4[%c0_5, %c0_6] : memref<64x128xf32, #tpu.memory_space<vmem>>, vector<64x128xf32>
    tpu.vector_store %arg4[%c0_5, %c0_6], %6 {strides = array<i32>} : memref<64x128xf32, #tpu.memory_space<vmem>>, vector<64x128xf32>,
    return
  }
  func.func @transform_0(%arg0: i32) -> (i32, i32) {
    %c0_i32 = arith.constant 0 : i32
    %c0_i32_0 = arith.constant 0 : i32
    return %arg0, %c0_i32 : i32, i32
  }
  func.func @transform_1(%arg0: i32) -> (i32, i32) {
    %c0_i32 = arith.constant 0 : i32
    %c0_i32_0 = arith.constant 0 : i32
    %c0_i32_1 = arith.constant 0 : i32
    return %c0_i32, %c0_i32_0 : i32, i32
  }
  func.func @transform_2(%arg0: i32) -> (i32, i32) {
    %c0_i32 = arith.constant 0 : i32
    %c0_i32_0 = arith.constant 0 : i32
    %c0_i32_1 = arith.constant 0 : i32
    return %c0_i32, %c0_i32_0 : i32, i32
  }
  func.func @transform_3(%arg0: i32) -> (i32, i32) {
    %c0_i32 = arith.constant 0 : i32
    %c0_i32_0 = arith.constant 0 : i32
    return %arg0, %c0_i32 : i32, i32
  }
}

</mosaic_0001>

<bundles_post_ra>
// kernel: multi_freq_siren_forward.1
= control target key start
LH: loop header
LB: loop body
LE: loop exit
PB: predicated region body
PF: predicated region fallthrough
CT: control target
= control target key end

     0   :  { %8 = vsyncpa [#allocation3], 0  ;;  %s2299_s0 = inlined_call_operand.vmem [shape: f32[256,4], index: 0, kind: input, shape index: {}]   ;;  %s2300_s1 = inlined_call_operand.vmem [shape: f32[4,128], index: 1, kind: input, shape index: {}]   ;;  %s2301_s2 = inlined_call_operand.vmem [shape: f32[1,128], index: 2, kind: input, shape index: {}]   ;;  %s2302_s3 = inlined_call_operand.hbm [shape: f32[256,128], index: 3, kind: output, shape index: {}]  }
   0x1   :  { %10 = vsyncpa [#allocation3 + $0x1], 0  ;;  %s1523_s12 = smov 0   ;;  %s1525_s13 = smov 0  }
   0x2   :  { %s1527_s14 = smov 0   ;;  %s1529_s15 = smov 0  }
   0x3 LB: > { %s1544_s16 = sadd.s32 4294967295, %s1492_s15   ;;  %s1238_s17 = sadd.s32 4294967294, %s1492_s15   ;;  %s1492_s15 = sphi %s1529_s15, %s2320_s15   ;;  %s1488_s14 = sphi %s1527_s14, %s2319_s14   ;;  %s1484_s13 = sphi %s1525_s13, %s2318_s13   ;;  %s1480_s12 = sphi %s1523_s12, %s2317_s12  }
   0x4   : > { %s1548_s18 = sadd.s32 1, %s1492_s15   ;;  %s91_s19 = sadd.s32 1, %s1488_s14 }
   0x5   : > { %s88_s20 = ssub.s32 %s1492_s15, %s1548_s18  ;;  %p101_p0 = scmp.ne.s32.totalorder %s1488_s14, %s1484_s13 }
   0x6   : > { %p89_p1 = scmp.eq.s32.totalorder %s88_s20, 0  ;;  %p102_p2 = scmp.eq.s32.totalorder %s1544_s16, 3 }
   0x7   : > { %p107_p3 = scmp.ne.s32.totalorder %s1484_s13, %s1480_s12  ;;  %p108_p4 = scmp.eq.s32.totalorder %s1238_s17, 3 }
   0x8   : > { %s1559_s21 = scalar_select %p89_p1, %s1488_s14, %s91_s19  }
   0x9   : > { %p1561_p5 = por %p102_p2, %p101_p0  ;;  %p1565_p6 = por %p108_p4, %p107_p3 }
   0xa   : > { %p1241_p7 = scmp.ge.s32.totalorder %s1492_s15, 1  ;;  %p141_p8 = scmp.lt.s32.totalorder %s1492_s15, 5 }
   0xc   : > { %p142_p9 = pnand %p1241_p7, %p141_p8 }
   0xd   : > { %v180_v0 = vld [vmem:[%s2300_s1] sm:$0xf] (!%p142_p9)  ;;  %vm213_vm0 = vcmask (!%p142_p9), 1043456   ;;  %s1243_s26 = sshll.u32 (!%p142_p9), %s1544_s16, 3  ;;  %vm188_vm1 = vcmask (!%p142_p9), 31744   ;;  %s162_s6 = sand.u32 (!%p142_p9), 1, %s1484_s13  }
   0xe   : > { %145 = sbr.rel (%p142_p9) target bundleno = 490 (0x1ea), region = 32  ;;  %1302 = vmatprep.subr.msk.mxu0 (!%p142_p9), %vm213_vm0, %v180_v0  ;;  %1316 = vmatprep.subr.msk.mxu1 (!%p142_p9), %vm213_vm0, %v180_v0  ;;  %p166_p10 = scmp.lt.s32.totalorder (!%p142_p9), %s1243_s26, 31  ;;  %v1589_v9 = vld [vmem:[%s2301_s2] ss:$0 sm:$0xff] (!%p142_p9)  ;;  %v1494_v50 = vmov (!%p142_p9), 683565275  }
   0xf   : > { %1303 = vmatpush3.msk.msra.mxu0 (!%p142_p9), %vm213_vm0, %v180_v0  ;;  %1317 = vmatpush3.msk.msra.mxu1 (!%p142_p9), %vm213_vm0, %v180_v0  ;;  %v1495_v54 = vmov (!%p142_p9), 2475754826   ;;  %v1496_v56 = vmov (!%p142_p9), 2131351028   ;;  %v1497_v58 = vmov (!%p142_p9), 2102212464  }
  0x10   : > { %v1498_v60 = vmov (!%p142_p9), 920167782   ;;  %s1242_s7 = sshll.u32 (!%p142_p9), %s162_s6, 6  ;;  %s1292_s11 = sshll.u32 (!%p142_p9), %s1544_s16, 10 }
  0x11   : > { %s1903_s8 = scalar_lea.vmem (!%p142_p9), [#allocation2], %s1242_s7  ;;  %s2250_s24 = scalar_lea.hbm (!%p142_p9), %s2302_s3, %s1292_s11 }
  0x12   : > { %s1176_s17 = sshll.u32 (!%p142_p9), %s1903_s8, 4  ;;  %s2258_s16 = scalar_lea.sflag (!%p142_p9), [#allocation3], %s162_s6  ;;  %s2252_s17 = int_to_ptr.vmem [resolvable:$true] %s1176_s17 }
  0x13   : > { %s1430_s25 = scalar_lea.vmem (!%p142_p9), %s2252_s17, 1024 }
  0x14   : > { %p1431_p11 = scmp.ne.s32.totalorder (!%p142_p9), %s2252_s17, %s1430_s25 }
  0x15   : > { %s2322_s26 = smov (!%p166_p10, %s1243_s26), 31 }
  0x16   : > { %s1244_s27 = sshll.u32 %s2322_s26, 3  ;;  %p1432_p12 = pnand %p1431_p11, %p1561_p5 }
  0x17   : > { %s169_s30 = scalar_lea.vmem %s2299_s0, %s1244_s27  ;;  %s1500_s26 = smov [#allocation2]  }
  0x18   : > { %v172_v1 = vld [vmem:[%s169_s30] sm:$0xff]  ;;  %v173_v3 = vld [vmem:[%s169_s30 + $0x8] sm:$0xff]  ;;  %v174_v5 = vld [vmem:[%s169_s30 + $0x10] sm:$0xff]  ;;  %p1433_p13 = pneg %p1432_p12  ;;  %s1434_s27 = sshll.u32 %s1500_s26, 4  ;;  %s1435_s27 = int_to_ptr.vmem [resolvable:$false] %s1434_s27 }
  0x19   : > { %v176_v2 = vld [vmem:[%s169_s30 + $0x20] sm:$0xff]  ;;  %1304 = vmatprep.mubr.msk.f32.mxu0 %vm188_vm1, %v172_v1  ;;  %v177_v4 = vld [vmem:[%s169_s30 + $0x28] sm:$0xff]  ;;  %v178_v6 = vld [vmem:[%s169_s30 + $0x30] sm:$0xff]  ;;  %s1436_s28 = scalar_lea.vmem %s1435_s27, 2048  ;;  %p1437_p0 = scmp.lt.s32.totalorder %s2252_s17, %s1435_s27 }
  0x1a   : > { %1310 = vmatprep.mubr.msk.f32.mxu1 %vm188_vm1, %v176_v2  ;;  %1305 = vmatmul.mubr.msk.f32.vlgmr.msra.gmra.mrb[0].mxu0 %vm188_vm1, %v173_v3  ;;  %v175_v7 = vld [vmem:[%s169_s30 + $0x18] sm:$0xff]  ;;  %v1499_v3 = vmov 1326507024   ;;  %p1438_p1 = scmp.lt.s32.totalorder %s1436_s28, %s1430_s25 }
  0x1b   : > { %1311 = vmatmul.mubr.msk.f32.vlgmr.msra.gmra.mrb[0].mxu1 %vm188_vm1, %v177_v4  ;;  %1307 = vmatprep.mubr.msk.f32.mxu0 %vm188_vm1, %v174_v5  ;;  %v179_v8 = vld [vmem:[%s169_s30 + $0x38] sm:$0xff] }
  0x1c   : > { %1313 = vmatprep.mubr.msk.f32.mxu1 %vm188_vm1, %v178_v6  ;;  %p1439_p2 = por %p1438_p1, %p1437_p0 }
  0x1e   : > { %1308 = vmatmul.mubr.msk.f32.gmra.mrb[2].mxu0 %vm188_vm1, %v175_v7  ;;  %p1440_p3 = pnand %p1439_p2, %p1433_p13 }
  0x1f   : > { %1314 = vmatmul.mubr.msk.f32.gmra.mrb[2].mxu1 %vm188_vm1, %v179_v8 }
  0xed   : > { %v1306_v10 = vpop.f32.mrb[0].mxu0 }
  0xee   : > { %v1312_v11 = vpop.f32.mrb[0].mxu1  ;;  %v1592_v12 = vadd.f32 %v1306_v10, %v1589_v9  ;;  %v283_v14 = vpop.f32.mrb[1].mxu0 }
  0xef   : > { %v1595_v13 = vadd.f32 %v1312_v11, %v1589_v9  ;;  %v303_v15 = vpop.f32.mrb[1].mxu1  ;;  %v1598_v16 = vadd.f32 %v1589_v9, %v283_v14 }
  0xf0   : > { %v426_v17 = vand.u32 2147483647, %v1592_v12  ;;  %v429_v18 = vand.u32 2139095040, %v1592_v12  ;;  %v1616_v34 = vadd.f32 %v1589_v9, %v303_v15  ;;  %vm428_vm15 = vcmp.lt.s32.totalorder %v1592_v12, 0 }
  0xf1   : > { %v842_v19 = vand.u32 2147483647, %v1595_v13  ;;  %v845_v20 = vand.u32 2139095040, %v1595_v13  ;;  %v1604_v21 = vpop.f32.mrb[2].mxu0  ;;  %v325_v27 = vand.u32 2139095040, %v1598_v16 }
  0xf2   : > { %v1606_v22 = vpop.f32.mrb[2].mxu1  ;;  %v430_v23 = vshrl.u32 %v429_v18, 23  ;;  %v433_v24 = vand.u32 8388607, %v426_v17  ;;  %v1613_v29 = vpop.f32.mrb[3].mxu0  ;;  %v741_v48 = vand.u32 2139095040, %v1616_v34 }
  0xf3   : > { %v846_v25 = vshrl.u32 %v845_v20, 23  ;;  %v849_v26 = vand.u32 8388607, %v842_v19  ;;  %v326_v31 = vshrl.u32 %v325_v27, 23  ;;  %v322_v37 = vand.u32 2147483647, %v1598_v16 }
  0xf4   : > { %v1259_v28 = vadd.s32 4294967169, %v430_v23  ;;  %v434_v32 = vor.u32 8388608, %v433_v24  ;;  %v1619_v39 = vpop.f32.mrb[3].mxu1  ;;  %vm1717_vm0 = vcmp.le.f32.partialorder %v426_v17, 0.7853982 }
  0xf5   : > { %v1275_v30 = vadd.s32 4294967169, %v846_v25  ;;  %v850_v35 = vor.u32 8388608, %v849_v26  ;;  %v1255_v38 = vadd.s32 4294967169, %v326_v31  ;;  %v1627_v46 = vand.u32 8388607, %v322_v37 }
  0xf6   : > { %v436_v33 = vadd.s32 1, %v1259_v28  ;;  %v1621_v43 = vshll.u32 %v434_v32, 8 }
  0xf7   : > { %v852_v36 = vadd.s32 1, %v1275_v30  ;;  %v1623_v45 = vshll.u32 %v850_v35, 8  ;;  %v1629_v47 = vadd.s32 1, %v1255_v38 }
  0xf8   : > { %vm437_vm2 = vcmp.gt.s32.totalorder %v436_v33, 0 }
  0xf9   : > { %v438_v40 = vsel %vm437_vm2, %v436_v33, 0  ;;  %vm853_vm3 = vcmp.gt.s32.totalorder %v852_v36, 0  ;;  %vm333_vm8 = vcmp.gt.s32.totalorder %v1629_v47, 0 }
  0xfa   : > { %v439_v41 = vshrl.u32 %v438_v40, 5  ;;  %v440_v42 = vand.u32 31, %v438_v40  ;;  %v854_v44 = vsel %vm853_vm3, %v852_v36, 0 }
  0xfb   : > { %v1633_v52 = vshrl.u32 %v854_v44, 5  ;;  %v856_v53 = vand.u32 31, %v854_v44 }
  0xfc   : > { %v441_v49 = vsub.s32 32, %v440_v42  ;;  %v443_v51 = vshll.u32 %v1494_v50, %v440_v42  ;;  %v446_v55 = vshll.u32 %v1495_v54, %v440_v42  ;;  %v449_v57 = vshll.u32 %v1496_v56, %v440_v42 }
  0xfd   : > { %v452_v59 = vshll.u32 %v1497_v58, %v440_v42  ;;  %v455_v61 = vshll.u32 %v1498_v60, %v440_v42  ;;  %vm458_vm4 = vcmp.lt.s32.totalorder %v439_v41, 1  ;;  %vm459_vm5 = vcmp.lt.s32.totalorder %v439_v41, 2 }
  0xfe   : > { %v444_v62 = vshrl.u32 %v1495_v54, %v441_v49  ;;  %v447_v63 = vshrl.u32 %v1496_v56, %v441_v49  ;;  %v450_v0 = vshrl.u32 %v1497_v58, %v441_v49  ;;  %v442_v1 = vshrl.u32 %v1494_v50, %v441_v49 }
  0xff   : > { %v453_v2 = vshrl.u32 %v1498_v60, %v441_v49  ;;  %v456_v4 = vshrl.u32 %v1499_v3, %v441_v49  ;;  %v857_v8 = vsub.s32 32, %v856_v53  ;;  %vm460_vm6 = vcmp.lt.s32.totalorder %v439_v41, 3 }
 0x100   : > { %v445_v5 = vor.u32 %v444_v62, %v443_v51  ;;  %v448_v6 = vor.u32 %v447_v63, %v446_v55  ;;  %v451_v7 = vor.u32 %v450_v0, %v449_v57  ;;  %vm461_vm7 = vcmp.lt.s32.totalorder %v439_v41, 4 }
 0x101   : > { %v454_v10 = vor.u32 %v453_v2, %v452_v59  ;;  %v457_v11 = vor.u32 %v456_v4, %v455_v61  ;;  %v859_v26 = vshll.u32 %v1494_v50, %v856_v53  ;;  %v860_v30 = vshrl.u32 %v1495_v54, %v857_v8 }
 0x102   : > { %v462_v14 = vsel %vm458_vm4, %v442_v1, %v445_v5  ;;  %v463_v15 = vsel %vm461_vm7, %v451_v7, 2102212464  ;;  %v466_v18 = vsel %vm458_vm4, %v445_v5, %v448_v6  ;;  %v470_v20 = vsel %vm458_vm4, %v448_v6, %v451_v7 }
 0x103   : > { %v464_v23 = vsel %vm460_vm6, %v448_v6, %v463_v15  ;;  %v467_v24 = vsel %vm461_vm7, %v454_v10, 920167782  ;;  %v471_v25 = vsel %vm461_vm7, %v457_v11, 1326507024  ;;  %v862_v31 = vshll.u32 %v1495_v54, %v856_v53 }
 0x104   : > { %v468_v27 = vsel %vm460_vm6, %v451_v7, %v467_v24  ;;  %v472_v28 = vsel %vm460_vm6, %v454_v10, %v471_v25  ;;  %v465_v32 = vsel %vm459_vm5, %v462_v14, %v464_v23  ;;  %v863_v36 = vshrl.u32 %v1496_v56, %v857_v8 }
 0x105   : > { %v469_v33 = vsel %vm459_vm5, %v466_v18, %v468_v27  ;;  %v473_v35 = vsel %vm459_vm5, %v470_v20, %v472_v28  ;;  %v861_v49 = vor.u32 %v860_v30, %v859_v26  ;;  %v865_v55 = vshll.u32 %v1496_v56, %v856_v53 }
 0x106   : > { %v1657_v38 = vmul.u32.u64.low %v1621_v43, %v473_v35  ;;  %v1658_v40 = vmul.u32.u64.high %v1621_v43, %v473_v35, %v1657_v38  ;;  %v1661_v42 = vmul.u32.u64.low %v1621_v43, %v469_v33  ;;  %v1662_v44 = vmul.u32.u64.high %v1621_v43, %v469_v33, %v1661_v42 }
 0x107   : > { %v864_v51 = vor.u32 %v863_v36, %v862_v31  ;;  %v866_v57 = vshrl.u32 %v1497_v58, %v857_v8  ;;  %v858_v59 = vshrl.u32 %v1494_v50, %v857_v8  ;;  %v868_v41 = vshll.u32 %v1497_v58, %v856_v53 }
 0x108   : > { %v869_v61 = vshrl.u32 %v1498_v60, %v857_v8  ;;  %v872_v62 = vshrl.u32 %v1499_v3, %v857_v8  ;;  %v481_v63 = vmul.u32 %v1621_v43, %v465_v32  ;;  %v871_v1 = vshll.u32 %v1498_v60, %v856_v53 }
 0x109   : > { %v867_v0 = vor.u32 %v866_v57, %v865_v55  ;;  %vm874_vm9 = vcmp.lt.s32.totalorder %v1633_v52, 1  ;;  %vm483_vm10 = vc.u32 %v1658_v40, %v1661_v42  ;;  %v484_v2 = vadd.s32 1, %v1662_v44 }
 0x10a   : > { %v870_v4 = vor.u32 %v869_v61, %v868_v41  ;;  %vm875_vm11 = vcmp.lt.s32.totalorder %v1633_v52, 2  ;;  %v873_v5 = vor.u32 %v872_v62, %v871_v1  ;;  %vm876_vm12 = vcmp.lt.s32.totalorder %v1633_v52, 3 }
 0x10b   : > { %vm877_vm13 = vcmp.lt.s32.totalorder %v1633_v52, 4  ;;  %v882_v6 = vsel %vm874_vm9, %v861_v49, %v864_v51  ;;  %v485_v43 = vsel %vm483_vm10, %v484_v2, %v1662_v44  ;;  %v886_v53 = vsel %vm874_vm9, %v864_v51, %v867_v0 }
 0x10c   : > { %v879_v7 = vsel %vm877_vm13, %v867_v0, 2102212464  ;;  %v883_v8 = vsel %vm877_vm13, %v870_v4, 920167782  ;;  %v486_v10 = vadd.s32 %v485_v43, %v481_v63  ;;  %v878_v11 = vsel %vm874_vm9, %v858_v59, %v861_v49 }
 0x10d   : > { %v884_v14 = vsel %vm876_vm12, %v867_v0, %v883_v8  ;;  %v887_v15 = vsel %vm877_vm13, %v873_v5, 1326507024  ;;  %v880_v18 = vsel %vm876_vm12, %v864_v51, %v879_v7  ;;  %v334_v24 = vsel %vm333_vm8, %v1629_v47, 0 }
 0x10e   : > { %v885_v20 = vsel %vm875_vm11, %v882_v6, %v884_v14  ;;  %v888_v23 = vsel %vm876_vm12, %v870_v4, %v887_v15  ;;  %v487_v25 = vadd.s32 536870912, %v486_v10  ;;  %v738_v32 = vand.u32 2147483647, %v1616_v34 }
 0x10f   : > { %v889_v26 = vsel %vm875_vm11, %v886_v53, %v888_v23  ;;  %v1687_v27 = vmul.u32.u64.low %v1623_v45, %v885_v20  ;;  %v1688_v28 = vmul.u32.u64.high %v1623_v45, %v885_v20, %v1687_v27  ;;  %v881_v35 = vsel %vm875_vm11, %v878_v11, %v880_v18 }
 0x110   : > { %v1692_v30 = vmul.u32.u64.low %v1623_v45, %v889_v26  ;;  %v1693_v31 = vmul.u32.u64.high %v1623_v45, %v889_v26, %v1692_v30  ;;  %v488_v33 = vshrl.u32 %v487_v25, 30  ;;  %v330_v47 = vor.u32 8388608, %v1627_v46 }
 0x111   : > { %v336_v36 = vand.u32 31, %v334_v24  ;;  %v900_v44 = vadd.s32 1, %v1688_v28  ;;  %v742_v51 = vshrl.u32 %v741_v48, 23  ;;  %v897_v55 = vmul.u32 %v1623_v45, %v881_v35 }
 0x112   : > { %v489_v38 = vshll.u32 %v488_v33, 30  ;;  %vm899_vm14 = vc.u32 %v1693_v31, %v1687_v27  ;;  %v1707_v57 = vand.u32 8388607, %v738_v32  ;;  %v1713_v59 = vshll.u32 %v330_v47, 8 }
 0x113   : > { %v337_v49 = vsub.s32 32, %v336_v36  ;;  %v901_v52 = vsel %vm899_vm14, %v900_v44, %v1688_v28  ;;  %v482_v45 = vadd.s32 %v1661_v42, %v1658_v40  ;;  %v1722_v61 = vshrl.u32 %v334_v24, 5 }
 0x114   : > { %v1710_v46 = vsub.s32 %v486_v10, %v489_v38  ;;  %v902_v41 = vadd.s32 %v901_v52, %v897_v55  ;;  %v1271_v2 = vadd.s32 4294967169, %v742_v51  ;;  %v512_v4 = vsub.s32 4, %v488_v33 }
 0x115   : > { %v340_v62 = vshrl.u32 %v1495_v54, %v337_v49  ;;  %v343_v0 = vshrl.u32 %v1496_v56, %v337_v49  ;;  %v346_v1 = vshrl.u32 %v1497_v58, %v337_v49  ;;  %v339_v17 = vshll.u32 %v1494_v50, %v336_v36 }
 0x116   : > { %v492_v63 = vsub.s32 0, %v1710_v46  ;;  %v903_v5 = vadd.s32 536870912, %v902_v41  ;;  %v746_v6 = vor.u32 8388608, %v1707_v57  ;;  %v342_v42 = vshll.u32 %v1495_v54, %v336_v36 }
 0x117   : > { %v345_v43 = vshll.u32 %v1496_v56, %v336_v36  ;;  %v349_v7 = vshrl.u32 %v1498_v60, %v337_v49  ;;  %v341_v53 = vor.u32 %v340_v62, %v339_v17  ;;  %v348_v10 = vshll.u32 %v1497_v58, %v336_v36 }
 0x118   : > { %v1260_v40 = vmin.u32 %v492_v63, %v1710_v46  ;;  %v904_v8 = vshrl.u32 %v903_v5, 30  ;;  %v352_v11 = vshrl.u32 %v1499_v3, %v337_v49  ;;  %v344_v15 = vor.u32 %v343_v0, %v342_v42 }
 0x119   : > { %v347_v18 = vor.u32 %v346_v1, %v345_v43  ;;  %v351_v20 = vshll.u32 %v1498_v60, %v336_v36  ;;  %v513_v23 = vsel %vm428_vm15, %v512_v4, %v488_v33  ;;  %v350_v25 = vor.u32 %v349_v7, %v348_v10 }
 0x11a   : > { %v494_v14 = vclz %v1260_v40  ;;  %v905_v24 = vshll.u32 %v904_v8, 30  ;;  %vm354_vm1 = vcmp.lt.s32.totalorder %v1722_v61, 1  ;;  %vm355_vm2 = vcmp.lt.s32.totalorder %v1722_v61, 2 }
 0x11b   : > { %v353_v28 = vor.u32 %v352_v11, %v351_v20  ;;  %vm357_vm3 = vcmp.lt.s32.totalorder %v1722_v61, 4  ;;  %vm844_vm4 = vcmp.lt.s32.totalorder %v1595_v13, 0  ;;  %v338_v35 = vshrl.u32 %v1494_v50, %v337_v49 }
 0x11c   : > { %v1261_v26 = vadd.s32 4294967294, %v494_v14  ;;  %v1743_v30 = vsub.s32 %v902_v41, %v905_v24  ;;  %vm356_vm5 = vcmp.lt.s32.totalorder %v1722_v61, 3  ;;  %v363_v33 = vsel %vm357_vm3, %v350_v25, 920167782 }
 0x11d   : > { %v515_v47 = vsel %vm1717_vm0, 0, %v513_v23  ;;  %v362_v36 = vsel %vm354_vm1, %v341_v53, %v344_v15  ;;  %v364_v38 = vsel %vm356_vm5, %v347_v18, %v363_v33  ;;  %v928_v55 = vsub.s32 4, %v904_v8 }
 0x11e   : > { %vm1262_vm6 = vcmp.lt.s32.totalorder %v1261_v26, 0  ;;  %v908_v51 = vsub.s32 0, %v1743_v30  ;;  %v366_v49 = vsel %vm354_vm1, %v344_v15, %v347_v18  ;;  %vm1760_vm7 = vcmp.le.f32.partialorder %v842_v19, 0.7853982 }
 0x11f   : > { %v497_v44 = vsel %vm1262_vm6, 0, %v1261_v26  ;;  %v359_v63 = vsel %vm357_vm3, %v347_v18, 2102212464  ;;  %v367_v0 = vsel %vm357_vm3, %v353_v28, 1326507024  ;;  %v365_v5 = vsel %vm355_vm2, %v362_v36, %v364_v38 }
 0x120   : > { %v498_v52 = vsub.s32 32, %v497_v44  ;;  %v502_v41 = vsub.s32 4294967266, %v497_v44  ;;  %v499_v1 = vshll.u32 %v1710_v46, %v497_v44  ;;  %v1276_v4 = vmin.u32 %v908_v51, %v1743_v30 }
 0x121   : > { %v368_v17 = vsel %vm356_vm5, %v350_v25, %v367_v0  ;;  %v748_v43 = vadd.s32 1, %v1271_v2  ;;  %v519_v7 = vadd.s32 3, %v515_v47  ;;  %v358_v11 = vsel %vm354_vm1, %v338_v35, %v341_v53 }
 0x122   : > { %v500_v19 = vshrl.u32 %v482_v45, %v498_v52  ;;  %v503_v40 = vadd.s32 127, %v502_v41  ;;  %v369_v42 = vsel %vm355_vm2, %v366_v49, %v368_v17  ;;  %v910_v10 = vclz %v1276_v4 }
 0x123   : > { %v360_v46 = vsel %vm356_vm5, %v344_v15, %v359_v63  ;;  %v1781_v20 = vmul.u32.u64.low %v1713_v59, %v369_v42  ;;  %v1782_v23 = vmul.u32.u64.high %v1713_v59, %v369_v42, %v1781_v20  ;;  %vm749_vm8 = vcmp.gt.s32.totalorder %v748_v43, 0 }
 0x124   : > { %v501_v14 = vor.u32 %v500_v19, %v499_v1  ;;  %v504_v18 = vshll.u32 %v503_v40, 23  ;;  %v1277_v45 = vadd.s32 4294967294, %v910_v10  ;;  %v898_v53 = vadd.s32 %v1687_v27, %v1693_v31 }
 0x125   : > { %v1785_v24 = vmul.u32.u64.low %v1713_v59, %v365_v5  ;;  %v1786_v25 = vmul.u32.u64.high %v1713_v59, %v365_v5, %v1785_v24  ;;  %v929_v15 = vsel %vm844_vm4, %v928_v55, %v904_v8  ;;  %v750_v26 = vsel %vm749_vm8, %v748_v43, 0 }
 0x126   : > { %v505_v2 = vor.u32 4788187, %v504_v18  ;;  %v1793_v28 = vand.u32 3, %v519_v7  ;;  %vm1278_vm9 = vcmp.lt.s32.totalorder %v1277_v45, 0  ;;  %v361_v35 = vsel %vm355_vm2, %v358_v11, %v360_v46 }
 0x127   : > { %v752_v33 = vand.u32 31, %v750_v26  ;;  %v508_v36 = vcvt.s32.f32 %v501_v14  ;;  %v913_v38 = vsel %vm1278_vm9, 0, %v1277_v45  ;;  %vm379_vm10 = vc.u32 %v1782_v23, %v1785_v24 }
 0x128   : > { %v506_v47 = vand.u32 2147483647, %v505_v2  ;;  %v914_v44 = vsub.s32 32, %v913_v38  ;;  %v918_v51 = vsub.s32 4294967266, %v913_v38  ;;  %v931_v27 = vsel %vm1760_vm7, 0, %v929_v15 }
 0x129   : > { %v380_v31 = vadd.s32 1, %v1786_v25  ;;  %v377_v55 = vmul.u32 %v1713_v59, %v361_v35  ;;  %v1803_v49 = vshrl.u32 %v750_v26, 5  ;;  %v753_v61 = vsub.s32 32, %v752_v33 }
 0x12a   : > { %v509_v8 = vmul.f32 %v508_v36, %v506_v47  ;;  %v915_v52 = vshll.u32 %v1743_v30, %v913_v38  ;;  %v916_v41 = vshrl.u32 %v898_v53, %v914_v44  ;;  %v919_v63 = vadd.s32 127, %v918_v51 }
 0x12b   : > { %v381_v0 = vsel %vm379_vm10, %v380_v31, %v1786_v25  ;;  %v755_v5 = vshll.u32 %v1494_v50, %v752_v33  ;;  %v756_v17 = vshrl.u32 %v1495_v54, %v753_v61  ;;  %v758_v42 = vshll.u32 %v1495_v54, %v752_v33 }
 0x12c   : > { %v510_v1 = vxor.u32 2147483648, %v509_v8  ;;  %v382_v4 = vadd.s32 %v381_v0, %v377_v55  ;;  %v917_v19 = vor.u32 %v916_v41, %v915_v52  ;;  %v920_v40 = vshll.u32 %v919_v63, 23 }
 0x12d   : > { %v759_v59 = vshrl.u32 %v1496_v56, %v753_v61  ;;  %v761_v7 = vshll.u32 %v1496_v56, %v752_v33  ;;  %v762_v10 = vshrl.u32 %v1497_v58, %v753_v61  ;;  %v757_v14 = vor.u32 %v756_v17, %v755_v5 }
 0x12e   : > { %v511_v43 = vsel %vm428_vm15, %v510_v1, %v509_v8  ;;  %v383_v30 = vadd.s32 536870912, %v382_v4  ;;  %v921_v46 = vor.u32 4788187, %v920_v40  ;;  %v764_v18 = vshll.u32 %v1497_v58, %v752_v33 }
 0x12f   : > { %v514_v11 = vsel %vm1717_vm0, %v1592_v12, %v511_v43  ;;  %v924_v20 = vcvt.s32.f32 %v917_v19  ;;  %v765_v25 = vshrl.u32 %v1498_v60, %v753_v61  ;;  %v760_v53 = vor.u32 %v759_v59, %v758_v42 }
 0x130   : > { %1397 = vcosq.f32 %v514_v11  ;;  %v1819_v45 = vshrl.u32 %v383_v30, 30  ;;  %v922_v2 = vand.u32 2147483647, %v921_v46  ;;  %v768_v15 = vshrl.u32 %v1499_v3, %v753_v61 }
 0x131   : > { %1399 = vsinq.f32 %v514_v11  ;;  %v766_v35 = vor.u32 %v765_v25, %v764_v18  ;;  %v763_v47 = vor.u32 %v762_v10, %v761_v7  ;;  %v767_v36 = vshll.u32 %v1498_v60, %v752_v33 }
 0x132   : > { %v385_v26 = vshll.u32 %v1819_v45, 30  ;;  %v925_v48 = vmul.f32 %v924_v20, %v922_v2  ;;  %v935_v38 = vadd.s32 3, %v931_v27  ;;  %vm770_vm11 = vcmp.lt.s32.totalorder %v1803_v49, 1 }
 0x133   : > { %v1830_v51 = vshll.u32 %v746_v6, 8  ;;  %vm522_vm12 = vcmp.eq.s32.totalorder %v1793_v28, 0  ;;  %v769_v8 = vor.u32 %v768_v15, %v767_v36  ;;  %vm773_vm13 = vcmp.lt.s32.totalorder %v1803_v49, 4 }
 0x134   : > { %v1825_v44 = vsub.s32 %v382_v4, %v385_v26  ;;  %v926_v31 = vxor.u32 2147483648, %v925_v48  ;;  %v778_v55 = vsel %vm770_vm11, %v757_v14, %v760_v53  ;;  %vm521_vm14 = vcmp.lt.s32.totalorder %v1793_v28, 2 }
 0x135   : > { %v754_v27 = vshrl.u32 %v1494_v50, %v753_v61  ;;  %vm772_vm15 = vcmp.lt.s32.totalorder %v1803_v49, 3  ;;  %v779_v57 = vsel %vm773_vm13, %v766_v35, 920167782  ;;  %vm518_vm0 = vweird.f32 %v1592_v12 }
 0x136   : > { %v388_v33 = vsub.s32 0, %v1825_v44  ;;  %v927_v6 = vsel %vm844_vm4, %v926_v31, %v925_v48  ;;  %vm324_vm1 = vcmp.lt.s32.totalorder %v1598_v16, 0  ;;  %vm771_vm2 = vcmp.lt.s32.totalorder %v1803_v49, 2 }
 0x137   : > { %v775_v52 = vsel %vm773_vm13, %v763_v47, 2102212464  ;;  %v780_v61 = vsel %vm772_vm15, %v763_v47, %v779_v57  ;;  %v930_v41 = vsel %vm1760_vm7, %v1595_v13, %v927_v6  ;;  %v782_v1 = vsel %vm770_vm11, %v760_v53, %v763_v47 }
 0x138   : > { %v1256_v63 = vmin.u32 %v388_v33, %v1825_v44  ;;  %v781_v0 = vsel %vm771_vm2, %v778_v55, %v780_v61  ;;  %1401 = vcosq.f32 %v930_v41  ;;  %v783_v4 = vsel %vm773_vm13, %v769_v8, 1326507024 }
 0x139   : > { %v1863_v5 = vmul.u32.u64.low %v1830_v51, %v781_v0  ;;  %v1864_v17 = vmul.u32.u64.high %v1830_v51, %v781_v0, %v1863_v5  ;;  %vm525_vm3 = vcmp.eq.s32.totalorder %v1793_v28, 2  ;;  %1403 = vsinq.f32 %v930_v41 }
 0x13a   : > { %v1398_v19 = vpop.eup %1397  ;;  %v390_v62 = vclz %v1256_v63  ;;  %v408_v40 = vsub.s32 4, %v1819_v45  ;;  %v774_v43 = vsel %vm770_vm11, %v754_v27, %v757_v14  ;;  %v776_v30 = vsel %vm772_vm15, %v760_v53, %v775_v52 }
 0x13b   : > { %v1400_v42 = vpop.eup %1399  ;;  %v526_v59 = vxor.u32 2147483648, %v1398_v19  ;;  %v784_v7 = vsel %vm772_vm15, %v766_v35, %v783_v4  ;;  %v1881_v18 = vadd.f32 %v1604_v21, %v1589_v9  ;;  %v936_v25 = vand.u32 3, %v935_v38 }
 0x13c   : > { %v523_v10 = vxor.u32 2147483648, %v1400_v42  ;;  %v1257_v11 = vadd.s32 4294967294, %v390_v62  ;;  %v785_v46 = vsel %vm771_vm2, %v782_v1, %v784_v7  ;;  %v777_v15 = vsel %vm771_vm2, %v774_v43, %v776_v30 }
 0x13d   : > { %v527_v20 = vsel %vm525_vm3, %v526_v59, %v1400_v42  ;;  %v1884_v2 = vmul.u32.u64.low %v1830_v51, %v785_v46  ;;  %v1885_v14 = vmul.u32.u64.high %v1830_v51, %v785_v46, %v1884_v2  ;;  %v796_v26 = vadd.s32 1, %v1864_v17 }
 0x13e   : > { %v524_v53 = vsel %vm522_vm12, %v1398_v19, %v523_v10  ;;  %vm1258_vm4 = vcmp.lt.s32.totalorder %v1257_v11, 0  ;;  %v378_v21 = vadd.s32 %v1785_v24, %v1782_v23  ;;  %v637_v47 = vand.u32 2139095040, %v1881_v18 }
 0x13f   : > { %v528_v35 = vsel %vm521_vm14, %v524_v53, %v527_v20  ;;  %v393_v48 = vsel %vm1258_vm4, 0, %v1257_v11  ;;  %vm934_vm5 = vweird.f32 %v1595_v13  ;;  %v409_v49 = vsel %vm324_vm1, %v408_v40, %v1819_v45 }
 0x140   : > { %v529_v36 = vsel %vm518_vm0, nan, %v528_v35  ;;  %v394_v38 = vsub.s32 32, %v393_v48  ;;  %v398_v31 = vsub.s32 4294967266, %v393_v48  ;;  %v793_v23 = vmul.u32 %v1830_v51, %v777_v15 }
 0x141   : > { %1155 = vst [vmem:[%s1903_s8 + $0x8] sm:$0xff] %v529_v36  ;;  %vm795_vm6 = vc.u32 %v1885_v14, %v1863_v5  ;;  %v634_v12 = vand.u32 2147483647, %v1881_v18  ;;  %v638_v24 = vshrl.u32 %v637_v47, 23  ;;  %v395_v28 = vshll.u32 %v1825_v44, %v393_v48 }
 0x142   : > { %v396_v8 = vshrl.u32 %v378_v21, %v394_v38  ;;  %v399_v55 = vadd.s32 127, %v398_v31  ;;  %v797_v33 = vsel %vm795_vm6, %v796_v26, %v1864_v17  ;;  %v1402_v27 = vpop.eup %1401  ;;  %vm941_vm7 = vcmp.eq.s32.totalorder %v936_v25, 2 }
 0x143   : > { %vm1914_vm8 = vcmp.le.f32.partialorder %v322_v37, 0.7853982  ;;  %v798_v51 = vadd.s32 %v797_v33, %v793_v23  ;;  %v1267_v57 = vadd.s32 4294967169, %v638_v24  ;;  %v1404_v6 = vpop.eup %1403  ;;  %v942_v52 = vxor.u32 2147483648, %v1402_v27 }
 0x144   : > { %v397_v61 = vor.u32 %v396_v8, %v395_v28  ;;  %v400_v41 = vshll.u32 %v399_v55, 23  ;;  %v411_v44 = vsel %vm1914_vm8, 0, %v409_v49  ;;  %v939_v63 = vxor.u32 2147483648, %v1404_v6 }
 0x145   : > { %v799_v0 = vadd.s32 536870912, %v798_v51  ;;  %v641_v1 = vand.u32 8388607, %v634_v12  ;;  %v644_v4 = vadd.s32 1, %v1267_v57  ;;  %vm937_vm9 = vcmp.lt.s32.totalorder %v936_v25, 2 }
 0x146   : > { %vm938_vm10 = vcmp.eq.s32.totalorder %v936_v25, 0  ;;  %v943_v37 = vsel %vm941_vm7, %v942_v52, %v1404_v6  ;;  %v401_v17 = vor.u32 4788187, %v400_v41  ;;  %v415_v62 = vadd.s32 3, %v411_v44 }
 0x147   : > { %v940_v19 = vsel %vm938_vm10, %v1402_v27, %v939_v63  ;;  %v1922_v40 = vshrl.u32 %v799_v0, 30  ;;  %vm645_vm11 = vcmp.gt.s32.totalorder %v644_v4, 0  ;;  %v404_v43 = vcvt.s32.f32 %v397_v61 }
 0x148   : > { %v944_v42 = vsel %vm937_vm9, %v940_v19, %v943_v37  ;;  %v402_v59 = vand.u32 2147483647, %v401_v17  ;;  %v646_v30 = vsel %vm645_vm11, %v644_v4, 0  ;;  %v642_v11 = vor.u32 8388608, %v641_v1 }
 0x149   : > { %v945_v7 = vsel %vm934_vm5, nan, %v944_v42  ;;  %v801_v10 = vshll.u32 %v1922_v40, 30  ;;  %v648_v20 = vand.u32 31, %v646_v30  ;;  %v1930_v53 = vand.u32 3, %v415_v62 }
 0x14a   : > { %1159 = vst [vmem:[%s1903_s8 + $0x28] sm:$0xff] %v945_v7  ;;  %v405_v46 = vmul.f32 %v404_v43, %v402_v59  ;;  %v1934_v26 = vadd.f32 %v1606_v22, %v1589_v9  ;;  %v794_v13 = vadd.s32 %v1863_v5, %v1885_v14  ;;  %v1939_v21 = vshrl.u32 %v646_v30, 5 }
 0x14b   : > { %v1928_v25 = vsub.s32 %v798_v51, %v801_v10  ;;  %v649_v15 = vsub.s32 32, %v648_v20  ;;  %v1941_v48 = vshll.u32 %v642_v11, 8  ;;  %v651_v36 = vshll.u32 %v1494_v50, %v648_v20 }
 0x14c   : > { %v406_v2 = vxor.u32 2147483648, %v405_v46  ;;  %v654_v14 = vshll.u32 %v1495_v54, %v648_v20  ;;  %v824_v23 = vsub.s32 4, %v1922_v40  ;;  %v657_v24 = vshll.u32 %v1496_v56, %v648_v20 }
 0x14d   : > { %v804_v35 = vsub.s32 0, %v1928_v25  ;;  %v652_v38 = vshrl.u32 %v1495_v54, %v649_v15  ;;  %v655_v31 = vshrl.u32 %v1496_v56, %v649_v15  ;;  %v658_v49 = vshrl.u32 %v1497_v58, %v649_v15 }
 0x14e   : > { %v407_v47 = vsel %vm324_vm1, %v406_v2, %v405_v46  ;;  %v1053_v28 = vand.u32 2139095040, %v1934_v26  ;;  %v660_v45 = vshll.u32 %v1497_v58, %v648_v20  ;;  %v661_v51 = vshrl.u32 %v1498_v60, %v649_v15 }
 0x14f   : > { %v410_v22 = vsel %vm1914_vm8, %v1598_v16, %v407_v47  ;;  %v1272_v5 = vmin.u32 %v804_v35, %v1928_v25  ;;  %v653_v55 = vor.u32 %v652_v38, %v651_v36  ;;  %v656_v33 = vor.u32 %v655_v31, %v654_v14 }
 0x150   : > { %1405 = vcosq.f32 %v410_v22  ;;  %v659_v27 = vor.u32 %v658_v49, %v657_v24  ;;  %vm666_vm12 = vcmp.lt.s32.totalorder %v1939_v21, 1  ;;  %v663_v6 = vshll.u32 %v1498_v60, %v648_v20 }
 0x151   : > { %1407 = vsinq.f32 %v410_v22  ;;  %v806_v8 = vclz %v1272_v5  ;;  %v664_v52 = vshrl.u32 %v1499_v3, %v649_v15  ;;  %vm667_vm13 = vcmp.lt.s32.totalorder %v1939_v21, 2 }
 0x152   : > { %vm421_vm14 = vcmp.eq.s32.totalorder %v1930_v53, 2  ;;  %v650_v61 = vshrl.u32 %v1494_v50, %v649_v15  ;;  %v662_v41 = vor.u32 %v661_v51, %v660_v45  ;;  %vm668_vm15 = vcmp.lt.s32.totalorder %v1939_v21, 3 }
 0x153   : > { %v1273_v57 = vadd.s32 4294967294, %v806_v8  ;;  %vm669_vm0 = vcmp.lt.s32.totalorder %v1939_v21, 4  ;;  %vm418_vm1 = vcmp.eq.s32.totalorder %v1930_v53, 0  ;;  %vm740_vm2 = vcmp.lt.s32.totalorder %v1616_v34, 0 }
 0x154   : > { %v665_v44 = vor.u32 %v664_v52, %v663_v6  ;;  %v671_v63 = vsel %vm669_vm0, %v659_v27, 2102212464  ;;  %v674_v0 = vsel %vm666_vm12, %v653_v55, %v656_v33  ;;  %vm417_vm4 = vcmp.lt.s32.totalorder %v1930_v53, 2 }
 0x155   : > { %vm1274_vm3 = vcmp.lt.s32.totalorder %v1273_v57, 0  ;;  %v670_v4 = vsel %vm666_vm12, %v650_v61, %v653_v55  ;;  %v675_v37 = vsel %vm669_vm0, %v662_v41, 920167782  ;;  %v1054_v17 = vshrl.u32 %v1053_v28, 23 }
 0x156   : > { %v809_v1 = vsel %vm1274_vm3, 0, %v1273_v57  ;;  %vm414_vm5 = vweird.f32 %v1598_v16  ;;  %v676_v42 = vsel %vm668_vm15, %v659_v27, %v675_v37  ;;  %v678_v59 = vsel %vm666_vm12, %v656_v33, %v659_v27 }
 0x157   : > { %v810_v19 = vsub.s32 32, %v809_v1  ;;  %v814_v62 = vsub.s32 4294967266, %v809_v1  ;;  %vm1985_vm6 = vcmp.le.f32.partialorder %v738_v32, 0.7853982  ;;  %v672_v30 = vsel %vm668_vm15, %v656_v33, %v671_v63 }
 0x158   : > { %v677_v7 = vsel %vm667_vm13, %v674_v0, %v676_v42  ;;  %v679_v10 = vsel %vm669_vm0, %v665_v44, 1326507024  ;;  %v1283_v11 = vadd.s32 4294967169, %v1054_v17  ;;  %v811_v46 = vshll.u32 %v1928_v25, %v809_v1 }
 0x159   : > { %v812_v20 = vshrl.u32 %v794_v13, %v810_v19  ;;  %v815_v2 = vadd.s32 127, %v814_v62  ;;  %v680_v32 = vsel %vm668_vm15, %v662_v41, %v679_v10  ;;  %v1050_v25 = vand.u32 2147483647, %v1934_v26 }
 0x15a   : > { %v1406_v15 = vpop.eup %1405  ;;  %v681_v35 = vsel %vm667_vm13, %v678_v59, %v680_v32  ;;  %v2001_v47 = vmul.u32.u64.low %v1941_v48, %v677_v7  ;;  %v2002_v36 = vmul.u32.u64.high %v1941_v48, %v677_v7, %v2001_v47  ;;  %v1060_v38 = vadd.s32 1, %v1283_v11 }
 0x15b   : > { %v1408_v31 = vpop.eup %1407  ;;  %v422_v22 = vxor.u32 2147483648, %v1406_v15  ;;  %v813_v5 = vor.u32 %v812_v20, %v811_v46  ;;  %v816_v14 = vshll.u32 %v815_v2, 23  ;;  %v673_v55 = vsel %vm667_vm13, %v670_v4, %v672_v30 }
 0x15c   : > { %v419_v13 = vxor.u32 2147483648, %v1408_v31  ;;  %v2007_v49 = vmul.u32.u64.low %v1941_v48, %v681_v35  ;;  %v2008_v24 = vmul.u32.u64.high %v1941_v48, %v681_v35, %v2007_v49  ;;  %vm1061_vm7 = vcmp.gt.s32.totalorder %v1060_v38, 0 }
 0x15d   : > { %v423_v28 = vsel %vm421_vm14, %v422_v22, %v1408_v31  ;;  %v817_v8 = vor.u32 4788187, %v816_v14  ;;  %v1062_v33 = vsel %vm1061_vm7, %v1060_v38, 0  ;;  %v825_v45 = vsel %vm740_vm2, %v824_v23, %v1922_v40 }
 0x15e   : > { %v420_v27 = vsel %vm418_vm1, %v1406_v15, %v419_v13  ;;  %v692_v51 = vadd.s32 1, %v2002_v36  ;;  %v1064_v57 = vand.u32 31, %v1062_v33  ;;  %v820_v61 = vcvt.s32.f32 %v813_v5 }
 0x15f   : > { %v424_v6 = vsel %vm417_vm4, %v420_v27, %v423_v28  ;;  %v818_v52 = vand.u32 2147483647, %v817_v8  ;;  %v1057_v21 = vand.u32 8388607, %v1050_v25  ;;  %v689_v44 = vmul.u32 %v1941_v48, %v673_v55 }
 0x160   : > { %v425_v41 = vsel %vm414_vm5, nan, %v424_v6  ;;  %vm691_vm8 = vc.u32 %v2008_v24, %v2001_v47  ;;  %v1065_v40 = vsub.s32 32, %v1064_v57  ;;  %v827_v53 = vsel %vm1985_vm6, 0, %v825_v45 }
 0x161   : > { %1154 = vst [vmem:[%s1903_s8] sm:$0xff] %v425_v41  ;;  %v821_v23 = vmul.f32 %v820_v61, %v818_v52  ;;  %v693_v63 = vsel %vm691_vm8, %v692_v51, %v2002_v36  ;;  %v1063_v0 = vshrl.u32 %v1062_v33, 5  ;;  %v1067_v4 = vshll.u32 %v1494_v50, %v1064_v57 }
 0x162   : > { %v694_v1 = vadd.s32 %v693_v63, %v689_v44  ;;  %v1068_v16 = vshrl.u32 %v1495_v54, %v1065_v40  ;;  %v1071_v37 = vshrl.u32 %v1496_v56, %v1065_v40  ;;  %v1070_v17 = vshll.u32 %v1495_v54, %v1064_v57 }
 0x163   : > { %v822_v48 = vxor.u32 2147483648, %v821_v23  ;;  %v1073_v19 = vshll.u32 %v1496_v56, %v1064_v57  ;;  %v1074_v62 = vshrl.u32 %v1497_v58, %v1065_v40  ;;  %v1076_v30 = vshll.u32 %v1497_v58, %v1064_v57 }
 0x164   : > { %v695_v42 = vadd.s32 536870912, %v694_v1  ;;  %v1069_v59 = vor.u32 %v1068_v16, %v1067_v4  ;;  %v1077_v7 = vshrl.u32 %v1498_v60, %v1065_v40  ;;  %v1072_v11 = vor.u32 %v1071_v37, %v1070_v17 }
 0x165   : > { %v823_v10 = vsel %vm740_vm2, %v822_v48, %v821_v23  ;;  %v1075_v46 = vor.u32 %v1074_v62, %v1073_v19  ;;  %v1080_v20 = vshrl.u32 %v1499_v3, %v1065_v40  ;;  %v1079_v35 = vshll.u32 %v1498_v60, %v1064_v57 }
 0x166   : > { %v826_v2 = vsel %vm1985_vm6, %v1616_v34, %v823_v10  ;;  %v2049_v32 = vshrl.u32 %v695_v42, 30  ;;  %v1078_v15 = vor.u32 %v1077_v7, %v1076_v30  ;;  %v831_v36 = vadd.s32 3, %v827_v53 }
 0x167   : > { %1409 = vcosq.f32 %v826_v2  ;;  %v1058_v38 = vor.u32 8388608, %v1057_v21  ;;  %vm1082_vm9 = vcmp.lt.s32.totalorder %v1063_v0, 1  ;;  %v1081_v22 = vor.u32 %v1080_v20, %v1079_v35 }
 0x168   : > { %1411 = vsinq.f32 %v826_v2  ;;  %v697_v31 = vshll.u32 %v2049_v32, 30  ;;  %vm1085_vm10 = vcmp.lt.s32.totalorder %v1063_v0, 4  ;;  %v1066_v5 = vshrl.u32 %v1494_v50, %v1065_v40 }
 0x169   : > { %vm1084_vm11 = vcmp.lt.s32.totalorder %v1063_v0, 3  ;;  %v1090_v43 = vsel %vm1082_vm9, %v1069_v59, %v1072_v11  ;;  %v1091_v14 = vsel %vm1085_vm10, %v1078_v15, 920167782  ;;  %vm1083_vm12 = vcmp.lt.s32.totalorder %v1063_v0, 2 }
 0x16a   : > { %v2056_v13 = vsub.s32 %v694_v1, %v697_v31  ;;  %v1087_v49 = vsel %vm1085_vm10, %v1075_v46, 2102212464  ;;  %v1092_v28 = vsel %vm1084_vm11, %v1075_v46, %v1091_v14  ;;  %v1094_v55 = vsel %vm1082_vm9, %v1072_v11, %v1075_v46 }
 0x16b   : > { %v1093_v8 = vsel %vm1083_vm12, %v1090_v43, %v1092_v28  ;;  %v1098_v33 = vshll.u32 %v1058_v38, 8  ;;  %v2064_v27 = vadd.f32 %v1589_v9, %v1613_v29  ;;  %v832_v45 = vand.u32 3, %v831_v36 }
 0x16c   : > { %v700_v51 = vsub.s32 0, %v2056_v13  ;;  %v1086_v57 = vsel %vm1082_vm9, %v1066_v5, %v1069_v59  ;;  %v1095_v6 = vsel %vm1085_vm10, %v1081_v22, 1326507024  ;;  %v1088_v52 = vsel %vm1084_vm11, %v1072_v11, %v1087_v49 }
 0x16d   : > { %v1096_v61 = vsel %vm1084_vm11, %v1078_v15, %v1095_v6  ;;  %v2071_v21 = vmul.u32.u64.low %v1098_v33, %v1093_v8  ;;  %v2072_v41 = vmul.u32.u64.high %v1098_v33, %v1093_v8, %v2071_v21  ;;  %vm830_vm13 = vweird.f32 %v1616_v34 }
 0x16e   : > { %v1268_v44 = vmin.u32 %v700_v51, %v2056_v13  ;;  %v1097_v9 = vsel %vm1083_vm12, %v1094_v55, %v1096_v61  ;;  %vm636_vm14 = vcmp.lt.s32.totalorder %v1881_v18, 0  ;;  %v533_v23 = vand.u32 2139095040, %v2064_v27 }
 0x16f   : > { %v2078_v29 = vmul.u32.u64.low %v1098_v33, %v1097_v9  ;;  %v2079_v40 = vmul.u32.u64.high %v1098_v33, %v1097_v9, %v2078_v29  ;;  %vm833_vm15 = vcmp.lt.s32.totalorder %v832_v45, 2  ;;  %v1089_v63 = vsel %vm1083_vm12, %v1086_v57, %v1088_v52 }
 0x170   : > { %v702_v53 = vclz %v1268_v44  ;;  %v530_v1 = vand.u32 2147483647, %v2064_v27  ;;  %vm834_vm0 = vcmp.eq.s32.totalorder %v832_v45, 0  ;;  %vm837_vm1 = vcmp.eq.s32.totalorder %v832_v45, 2 }
 0x171   : > { %v1410_v4 = vpop.eup %1409  ;;  %v1108_v16 = vadd.s32 1, %v2072_v41  ;;  %v534_v37 = vshrl.u32 %v533_v23, 23  ;;  %v690_v19 = vadd.s32 %v2001_v47, %v2008_v24  ;;  %v720_v42 = vsub.s32 4, %v2049_v32 }
 0x172   : > { %v1412_v48 = vpop.eup %1411  ;;  %v838_v17 = vxor.u32 2147483648, %v1410_v4  ;;  %v1269_v62 = vadd.s32 4294967294, %v702_v53  ;;  %v1105_v30 = vmul.u32 %v1098_v33, %v1089_v63  ;;  %vm1107_vm2 = vc.u32 %v2079_v40, %v2071_v21 }
 0x173   : > { %v835_v59 = vxor.u32 2147483648, %v1412_v48  ;;  %v1263_v0 = vadd.s32 4294967169, %v534_v37  ;;  %v1109_v10 = vsel %vm1107_vm2, %v1108_v16, %v2072_v41  ;;  %v537_v11 = vand.u32 8388607, %v530_v1 }
 0x174   : > { %v839_v7 = vsel %vm837_vm1, %v838_v17, %v1412_v48  ;;  %vm1270_vm3 = vcmp.lt.s32.totalorder %v1269_v62, 0  ;;  %v1110_v47 = vadd.s32 %v1109_v10, %v1105_v30  ;;  %v721_v36 = vsel %vm636_vm14, %v720_v42, %v2049_v32 }
 0x175   : > { %v836_v46 = vsel %vm834_vm0, %v1410_v4, %v835_v59  ;;  %v705_v20 = vsel %vm1270_vm3, 0, %v1269_v62  ;;  %v540_v24 = vadd.s32 1, %v1263_v0  ;;  %vm2101_vm4 = vcmp.le.f32.partialorder %v634_v12, 0.7853982 }
 0x176   : > { %v840_v2 = vsel %vm833_vm15, %v836_v46, %v839_v7  ;;  %v706_v15 = vsub.s32 32, %v705_v20  ;;  %v710_v35 = vsub.s32 4294967266, %v705_v20  ;;  %v1111_v22 = vadd.s32 536870912, %v1110_v47 }
 0x177   : > { %v841_v38 = vsel %vm830_vm13, nan, %v840_v2  ;;  %vm541_vm5 = vcmp.gt.s32.totalorder %v540_v24, 0  ;;  %v707_v5 = vshll.u32 %v2056_v13, %v705_v20  ;;  %v723_v32 = vsel %vm2101_vm4, 0, %v721_v36  ;;  %v1429_v13 = vld [vmem:[%s2301_s2] ss:$0 sm:$0xff] }
 0x178   : > { %1158 = vst [vmem:[%s1903_s8 + $0x20] sm:$0xff] %v841_v38  ;;  %v708_v43 = vshrl.u32 %v690_v19, %v706_v15  ;;  %v711_v14 = vadd.s32 127, %v710_v35  ;;  %v542_v49 = vsel %vm541_vm5, %v540_v24, 0  ;;  %v2109_v28 = vshrl.u32 %v1111_v22, 30 }
 0x179   : > { %v538_v34 = vor.u32 8388608, %v537_v11  ;;  %v544_v8 = vand.u32 31, %v542_v49  ;;  %v727_v57 = vadd.s32 3, %v723_v32  ;;  %v2116_v6 = vadd.f32 %v1429_v13, %v1619_v39 }
 0x17a   : > { %v709_v55 = vor.u32 %v708_v43, %v707_v5  ;;  %v712_v12 = vshll.u32 %v711_v14, 23  ;;  %v1113_v33 = vshll.u32 %v2109_v28, 30  ;;  %v1106_v52 = vadd.s32 %v2071_v21, %v2079_v40 }
 0x17b   : > { %v545_v45 = vsub.s32 32, %v544_v8  ;;  %v2122_v44 = vshll.u32 %v538_v34, 8  ;;  %v543_v4 = vshrl.u32 %v542_v49, 5  ;;  %v547_v39 = vshll.u32 %v1494_v50, %v544_v8 }
 0x17c   : > { %v713_v51 = vor.u32 4788187, %v712_v12  ;;  %v2119_v61 = vsub.s32 %v1110_v47, %v1113_v33  ;;  %v716_v29 = vcvt.s32.f32 %v709_v55  ;;  %v550_v16 = vshll.u32 %v1495_v54, %v544_v8 }
 0x17d   : > { %v548_v41 = vshrl.u32 %v1495_v54, %v545_v45  ;;  %v551_v23 = vshrl.u32 %v1496_v56, %v545_v45  ;;  %v554_v53 = vshrl.u32 %v1497_v58, %v545_v45  ;;  %v553_v40 = vshll.u32 %v1496_v56, %v544_v8 }
 0x17e   : > { %v714_v9 = vand.u32 2147483647, %v713_v51  ;;  %v1116_v63 = vsub.s32 0, %v2119_v61  ;;  %v556_v37 = vshll.u32 %v1497_v58, %v544_v8  ;;  %v557_v48 = vshrl.u32 %v1498_v60, %v545_v45 }
 0x17f   : > { %v549_v19 = vor.u32 %v548_v41, %v547_v39  ;;  %v552_v62 = vor.u32 %v551_v23, %v550_v16  ;;  %v560_v42 = vshrl.u32 %v1499_v3, %v545_v45  ;;  %v555_v30 = vor.u32 %v554_v53, %v553_v40 }
 0x180   : > { %v717_v21 = vmul.f32 %v716_v29, %v714_v9  ;;  %v1284_v17 = vmin.u32 %v1116_v63, %v2119_v61  ;;  %v558_v0 = vor.u32 %v557_v48, %v556_v37  ;;  %v559_v7 = vshll.u32 %v1498_v60, %v544_v8 }
 0x181   : > { %vm1052_vm6 = vcmp.lt.s32.totalorder %v1934_v26, 0  ;;  %v1136_v11 = vsub.s32 4, %v2109_v28  ;;  %v546_v46 = vshrl.u32 %v1494_v50, %v545_v45  ;;  %v949_v20 = vand.u32 2139095040, %v2116_v6 }
 0x182   : > { %v718_v59 = vxor.u32 2147483648, %v717_v21  ;;  %v1118_v10 = vclz %v1284_v17  ;;  %v561_v24 = vor.u32 %v560_v42, %v559_v7  ;;  %vm562_vm7 = vcmp.lt.s32.totalorder %v543_v4, 1 }
 0x183   : > { %vm563_vm8 = vcmp.lt.s32.totalorder %v543_v4, 2  ;;  %vm564_vm9 = vcmp.lt.s32.totalorder %v543_v4, 3  ;;  %vm565_vm10 = vcmp.lt.s32.totalorder %v543_v4, 4  ;;  %v570_v36 = vsel %vm562_vm7, %v549_v19, %v552_v62 }
 0x184   : > { %v719_v47 = vsel %vm636_vm14, %v718_v59, %v717_v21  ;;  %v1285_v15 = vadd.s32 4294967294, %v1118_v10  ;;  %v567_v35 = vsel %vm565_vm10, %v555_v30, 2102212464  ;;  %v571_v38 = vsel %vm565_vm10, %v558_v0, 920167782 }
 0x185   : > { %v722_v2 = vsel %vm2101_vm4, %v1881_v18, %v719_v47  ;;  %v566_v22 = vsel %vm562_vm7, %v546_v46, %v549_v19  ;;  %v572_v5 = vsel %vm564_vm9, %v555_v30, %v571_v38  ;;  %v574_v31 = vsel %vm562_vm7, %v552_v62, %v555_v30 }
 0x186   : > { %1413 = vcosq.f32 %v722_v2  ;;  %vm1286_vm11 = vcmp.lt.s32.totalorder %v1285_v15, 0  ;;  %v573_v14 = vsel %vm563_vm8, %v570_v36, %v572_v5  ;;  %v575_v49 = vsel %vm565_vm10, %v561_v24, 1326507024 }
 0x187   : > { %1415 = vsinq.f32 %v722_v2  ;;  %v1121_v43 = vsel %vm1286_vm11, 0, %v1285_v15  ;;  %v568_v8 = vsel %vm564_vm9, %v552_v62, %v567_v35  ;;  %v576_v55 = vsel %vm564_vm9, %v558_v0, %v575_v49 }
 0x188   : > { %v1122_v32 = vsub.s32 32, %v1121_v43  ;;  %v1126_v34 = vsub.s32 4294967266, %v1121_v43  ;;  %v1123_v12 = vshll.u32 %v2119_v61, %v1121_v43  ;;  %v577_v33 = vsel %vm563_vm8, %v574_v31, %v576_v55 }
 0x189   : > { %v2154_v45 = vmul.u32.u64.low %v2122_v44, %v573_v14  ;;  %v2155_v51 = vmul.u32.u64.high %v2122_v44, %v573_v14, %v2154_v45  ;;  %v2159_v9 = vmul.u32.u64.low %v2122_v44, %v577_v33  ;;  %v2160_v29 = vmul.u32.u64.high %v2122_v44, %v577_v33, %v2159_v9 }
 0x18a   : > { %v1124_v13 = vshrl.u32 %v1106_v52, %v1122_v32  ;;  %v1127_v41 = vadd.s32 127, %v1126_v34  ;;  %v728_v23 = vand.u32 3, %v727_v57  ;;  %v1137_v53 = vsel %vm1052_vm6, %v1136_v11, %v2109_v28 }
 0x18b   : > { %v569_v61 = vsel %vm563_vm8, %v566_v22, %v568_v8  ;;  %v950_v63 = vshrl.u32 %v949_v20, 23  ;;  %vm2168_vm12 = vcmp.le.f32.partialorder %v1050_v25, 0.7853982  ;;  %v588_v52 = vadd.s32 1, %v2155_v51 }
 0x18c   : > { %v1125_v39 = vor.u32 %v1124_v13, %v1123_v12  ;;  %v1128_v16 = vshll.u32 %v1127_v41, 23  ;;  %v946_v40 = vand.u32 2147483647, %v2116_v6  ;;  %v1139_v28 = vsel %vm2168_vm12, 0, %v1137_v53 }
 0x18d   : > { %v1279_v57 = vadd.s32 4294967169, %v950_v63  ;;  %v585_v4 = vmul.u32 %v2122_v44, %v569_v61  ;;  %vm587_vm13 = vc.u32 %v2160_v29, %v2154_v45  ;;  %vm730_vm14 = vcmp.eq.s32.totalorder %v728_v23, 0 }
 0x18e   : > { %v1129_v37 = vor.u32 4788187, %v1128_v16  ;;  %vm733_vm15 = vcmp.eq.s32.totalorder %v728_v23, 2  ;;  %v589_v25 = vsel %vm587_vm13, %v588_v52, %v2155_v51  ;;  %v1132_v59 = vcvt.s32.f32 %v1125_v39 }
 0x18f   : > { %v956_v17 = vadd.s32 1, %v1279_v57  ;;  %v590_v30 = vadd.s32 %v589_v25, %v585_v4  ;;  %v1143_v7 = vadd.s32 3, %v1139_v28  ;;  %v953_v10 = vand.u32 8388607, %v946_v40 }
 0x190   : > { %v1414_v48 = vpop.eup %1413  ;;  %v1130_v42 = vand.u32 2147483647, %v1129_v37  ;;  %vm729_vm1 = vcmp.lt.s32.totalorder %v728_v23, 2  ;;  %vm726_vm2 = vweird.f32 %v1881_v18  ;;  %v586_v39 = vadd.s32 %v2154_v45, %v2160_v29 }
 0x191   : > { %v1416_v19 = vpop.eup %1415  ;;  %v734_v62 = vxor.u32 2147483648, %v1414_v48  ;;  %vm957_vm0 = vcmp.gt.s32.totalorder %v956_v17, 0  ;;  %v591_v46 = vadd.s32 536870912, %v590_v30  ;;  %v2186_v38 = vand.u32 3, %v1143_v7 }
 0x192   : > { %v731_v0 = vxor.u32 2147483648, %v1416_v19  ;;  %v1133_v11 = vmul.f32 %v1132_v59, %v1130_v42  ;;  %v958_v20 = vsel %vm957_vm0, %v956_v17, 0  ;;  %v954_v14 = vor.u32 8388608, %v953_v10 }
 0x193   : > { %v735_v44 = vsel %vm733_vm15, %v734_v62, %v1416_v19  ;;  %v960_v24 = vand.u32 31, %v958_v20  ;;  %v2184_v35 = vshrl.u32 %v591_v46, 30  ;;  %v959_v33 = vshrl.u32 %v958_v20, 5 }
 0x194   : > { %v732_v47 = vsel %vm730_vm14, %v1414_v48, %v731_v0  ;;  %v1134_v15 = vxor.u32 2147483648, %v1133_v11  ;;  %vm1149_vm3 = vcmp.eq.s32.totalorder %v2186_v38, 2  ;;  %v994_v63 = vshll.u32 %v954_v14, 8 }
 0x195   : > { %v736_v2 = vsel %vm729_vm1, %v732_v47, %v735_v44  ;;  %v961_v22 = vsub.s32 32, %v960_v24  ;;  %v593_v43 = vshll.u32 %v2184_v35, 30  ;;  %v963_v31 = vshll.u32 %v1494_v50, %v960_v24 }
 0x196   : > { %v737_v36 = vsel %vm726_vm2, nan, %v736_v2  ;;  %v1135_v5 = vsel %vm1052_vm6, %v1134_v15, %v1133_v11  ;;  %v966_v32 = vshll.u32 %v1495_v54, %v960_v24  ;;  %v969_v55 = vshll.u32 %v1496_v56, %v960_v24 }
 0x197   : > { %1157 = vst [vmem:[%s1903_s8 + $0x18] sm:$0xff] %v737_v36  ;;  %v1138_v18 = vsel %vm2168_vm12, %v1934_v26, %v1135_v5  ;;  %v964_v49 = vshrl.u32 %v1495_v54, %v961_v22  ;;  %v967_v34 = vshrl.u32 %v1496_v56, %v961_v22  ;;  %v2199_v8 = vsub.s32 %v590_v30, %v593_v43 }
 0x198   : > { %1417 = vcosq.f32 %v1138_v18  ;;  %v970_v12 = vshrl.u32 %v1497_v58, %v961_v22  ;;  %v972_v23 = vshll.u32 %v1497_v58, %v960_v24  ;;  %v973_v54 = vshrl.u32 %v1498_v60, %v961_v22 }
 0x199   : > { %1419 = vsinq.f32 %v1138_v18  ;;  %v596_v51 = vsub.s32 0, %v2199_v8  ;;  %v965_v13 = vor.u32 %v964_v49, %v963_v31  ;;  %v968_v41 = vor.u32 %v967_v34, %v966_v32 }
 0x19a   : > { %v971_v9 = vor.u32 %v970_v12, %v969_v55  ;;  %v975_v53 = vshll.u32 %v1498_v60, %v960_v24  ;;  %v976_v61 = vshrl.u32 %v1499_v3, %v961_v22  ;;  %v962_v16 = vshrl.u32 %v1494_v50, %v961_v22 }
 0x19b   : > { %v1264_v56 = vmin.u32 %v596_v51, %v2199_v8  ;;  %v974_v21 = vor.u32 %v973_v54, %v972_v23  ;;  %vm978_vm4 = vcmp.lt.s32.totalorder %v959_v33, 1  ;;  %vm980_vm5 = vcmp.lt.s32.totalorder %v959_v33, 3 }
 0x19c   : > { %v977_v52 = vor.u32 %v976_v61, %v975_v53  ;;  %vm981_vm6 = vcmp.lt.s32.totalorder %v959_v33, 4  ;;  %v986_v60 = vsel %vm978_vm4, %v965_v13, %v968_v41  ;;  %v990_v3 = vsel %vm978_vm4, %v968_v41, %v971_v9 }
 0x19d   : > { %v598_v57 = vclz %v1264_v56  ;;  %v983_v58 = vsel %vm981_vm6, %v971_v9, 2102212464  ;;  %v987_v37 = vsel %vm981_vm6, %v974_v21, 920167782  ;;  %vm979_vm7 = vcmp.lt.s32.totalorder %v959_v33, 2 }
 0x19e   : > { %v988_v4 = vsel %vm980_vm5, %v971_v9, %v987_v37  ;;  %v991_v48 = vsel %vm981_vm6, %v977_v52, 1326507024  ;;  %v982_v25 = vsel %vm978_vm4, %v962_v16, %v965_v13  ;;  %v984_v17 = vsel %vm980_vm5, %v968_v41, %v983_v58 }
 0x19f   : > { %v1265_v28 = vadd.s32 4294967294, %v598_v57  ;;  %v989_v45 = vsel %vm979_vm7, %v986_v60, %v988_v4  ;;  %v992_v29 = vsel %vm980_vm5, %v974_v21, %v991_v48  ;;  %v985_v20 = vsel %vm979_vm7, %v982_v25, %v984_v17 }
 0x1a0   : > { %v993_v19 = vsel %vm979_vm7, %v990_v3, %v992_v29  ;;  %v2215_v62 = vmul.u32.u64.low %v994_v63, %v989_v45  ;;  %v2216_v42 = vmul.u32.u64.high %v994_v63, %v989_v45, %v2215_v62  ;;  %vm1145_vm9 = vcmp.lt.s32.totalorder %v2186_v38, 2 }
 0x1a1   : > { %vm1266_vm8 = vcmp.lt.s32.totalorder %v1265_v28, 0  ;;  %v2218_v7 = vmul.u32.u64.low %v994_v63, %v993_v19  ;;  %v2219_v10 = vmul.u32.u64.high %v994_v63, %v993_v19, %v2218_v7  ;;  %vm1146_vm10 = vcmp.eq.s32.totalorder %v2186_v38, 0 }
 0x1a2   : > { %v1418_v50 = vpop.eup %1417  ;;  %v601_v0 = vsel %vm1266_vm8, 0, %v1265_v28  ;;  %v1004_v22 = vadd.s32 1, %v2216_v42  ;;  %vm1142_vm11 = vweird.f32 %v1934_v26  ;;  %v1001_v43 = vmul.u32 %v994_v63, %v985_v20 }
 0x1a3   : > { %v1420_v59 = vpop.eup %1419  ;;  %v1150_v30 = vxor.u32 2147483648, %v1418_v50  ;;  %v602_v11 = vsub.s32 32, %v601_v0  ;;  %v606_v46 = vsub.s32 4294967266, %v601_v0  ;;  %v603_v24 = vshll.u32 %v2199_v8, %v601_v0 }
 0x1a4   : > { %v1147_v44 = vxor.u32 2147483648, %v1420_v59  ;;  %vm1003_vm12 = vc.u32 %v2219_v10, %v2215_v62  ;;  %v616_v51 = vsub.s32 4, %v2184_v35  ;;  %vm532_vm13 = vcmp.lt.s32.totalorder %v2064_v27, 0 }
 0x1a5   : > { %v1151_v47 = vsel %vm1149_vm3, %v1150_v30, %v1420_v59  ;;  %v604_v15 = vshrl.u32 %v586_v39, %v602_v11  ;;  %v607_v36 = vadd.s32 127, %v606_v46  ;;  %v1005_v49 = vsel %vm1003_vm12, %v1004_v22, %v2216_v42 }
 0x1a6   : > { %v1148_v2 = vsel %vm1146_vm10, %v1418_v50, %v1147_v44  ;;  %v1006_v38 = vadd.s32 %v1005_v49, %v1001_v43  ;;  %vm531_vm14 = vcmp.le.f32.partialorder %v530_v1, 0.7853982  ;;  %v617_v23 = vsel %vm532_vm13, %v616_v51, %v2184_v35 }
 0x1a7   : > { %v1152_v5 = vsel %vm1145_vm9, %v1148_v2, %v1151_v47  ;;  %v605_v31 = vor.u32 %v604_v15, %v603_v24  ;;  %v608_v18 = vshll.u32 %v607_v36, 23  ;;  %v619_v61 = vsel %vm531_vm14, 0, %v617_v23 }
 0x1a8   : > { %v1153_v14 = vsel %vm1142_vm11, nan, %v1152_v5  ;;  %v1007_v34 = vadd.s32 536870912, %v1006_v38  ;;  %v623_v39 = vadd.s32 3, %v619_v61  ;;  %v1002_v57 = vadd.s32 %v2215_v62, %v2219_v10 }
 0x1a9   : > { %1161 = vst [vmem:[%s1903_s8 + $0x38] sm:$0xff] %v1153_v14  ;;  %v609_v32 = vor.u32 4788187, %v608_v18  ;;  %v612_v55 = vcvt.s32.f32 %v605_v31  ;;  %vm622_vm3 = vweird.f32 %v2064_v27  ;;  %vm948_vm4 = vcmp.lt.s32.totalorder %v2116_v6, 0 }
 0x1aa   : > { %v1008_v12 = vshrl.u32 %v1007_v34, 30  ;;  %v624_v21 = vand.u32 3, %v623_v39  ;;  %vm947_vm5 = vcmp.le.f32.partialorder %v946_v40, 0.7853982  ;;  %vm1038_vm9 = vweird.f32 %v2116_v6 }
 0x1ab   : > { %v610_v8 = vand.u32 2147483647, %v609_v32 }
 0x1ac   : > { %v1009_v26 = vshll.u32 %v1008_v12, 30  ;;  %vm629_vm0 = vcmp.eq.s32.totalorder %v624_v21, 2  ;;  %vm626_vm1 = vcmp.eq.s32.totalorder %v624_v21, 0  ;;  %vm625_vm2 = vcmp.lt.s32.totalorder %v624_v21, 2 }
 0x1ad   : > { %v613_v33 = vmul.f32 %v612_v55, %v610_v8  ;;  %v1032_v0 = vsub.s32 4, %v1008_v12 }
 0x1ae   : > { %v1010_v41 = vsub.s32 %v1006_v38, %v1009_v26 }
 0x1af   : > { %v614_v13 = vxor.u32 2147483648, %v613_v33  ;;  %v1033_v44 = vsel %vm948_vm4, %v1032_v0, %v1008_v12 }
 0x1b0   : > { %v1012_v53 = vsub.s32 0, %v1010_v41  ;;  %v1035_v11 = vsel %vm947_vm5, 0, %v1033_v44 }
 0x1b1   : > { %v615_v9 = vsel %vm532_vm13, %v614_v13, %v613_v33  ;;  %v1039_v46 = vadd.s32 3, %v1035_v11 }
 0x1b2   : > { %v618_v54 = vsel %vm531_vm14, %v2064_v27, %v615_v9  ;;  %v1280_v56 = vmin.u32 %v1012_v53, %v1010_v41 }
 0x1b3   : > { %1421 = vcosq.f32 %v618_v54  ;;  %v1040_v20 = vand.u32 3, %v1039_v46 }
 0x1b4   : > { %1423 = vsinq.f32 %v618_v54  ;;  %v1014_v63 = vclz %v1280_v56 }
 0x1b5   : > { %vm1045_vm6 = vcmp.eq.s32.totalorder %v1040_v20, 2  ;;  %vm1042_vm7 = vcmp.eq.s32.totalorder %v1040_v20, 0  ;;  %vm1041_vm8 = vcmp.lt.s32.totalorder %v1040_v20, 2 }
 0x1b6   : > { %v1281_v16 = vadd.s32 4294967294, %v1014_v63 }
 0x1b8   : > { %vm1282_vm15 = vcmp.lt.s32.totalorder %v1281_v16, 0 }
 0x1b9   : > { %v1017_v52 = vsel %vm1282_vm15, 0, %v1281_v16 }
 0x1ba   : > { %v1018_v58 = vsub.s32 32, %v1017_v52  ;;  %v1022_v1 = vsub.s32 4294967266, %v1017_v52  ;;  %v1019_v3 = vshll.u32 %v1010_v41, %v1017_v52 }
 0x1bc   : > { %v1020_v28 = vshrl.u32 %v1002_v57, %v1018_v58  ;;  %v1023_v4 = vadd.s32 127, %v1022_v1 }
 0x1bd   : > { %v1422_v60 = vpop.eup %1421 }
 0x1be   : > { %v1424_v37 = vpop.eup %1423  ;;  %v630_v35 = vxor.u32 2147483648, %v1422_v60  ;;  %v1021_v17 = vor.u32 %v1020_v28, %v1019_v3  ;;  %v1024_v45 = vshll.u32 %v1023_v4, 23 }
 0x1bf   : > { %v627_v48 = vxor.u32 2147483648, %v1424_v37 }
 0x1c0   : > { %v631_v25 = vsel %vm629_vm0, %v630_v35, %v1424_v37  ;;  %v1025_v19 = vor.u32 4788187, %v1024_v45  ;;  %v1028_v59 = vcvt.s32.f32 %v1021_v17 }
 0x1c1   : > { %v628_v29 = vsel %vm626_vm1, %v1422_v60, %v627_v48 }
 0x1c2   : > { %v632_v50 = vsel %vm625_vm2, %v628_v29, %v631_v25  ;;  %v1026_v42 = vand.u32 2147483647, %v1025_v19 }
 0x1c3   : > { %v633_v62 = vsel %vm622_vm3, nan, %v632_v50 }
 0x1c4   : > { %1156 = vst [vmem:[%s1903_s8 + $0x10] sm:$0xff] %v633_v62  ;;  %v1029_v30 = vmul.f32 %v1028_v59, %v1026_v42 }
 0x1c6   : > { %v1030_v7 = vxor.u32 2147483648, %v1029_v30 }
 0x1c8   : > { %v1031_v10 = vsel %vm948_vm4, %v1030_v7, %v1029_v30 }
 0x1c9   : > { %v1034_v27 = vsel %vm947_vm5, %v2116_v6, %v1031_v10 }
 0x1ca   : > { %1425 = vcosq.f32 %v1034_v27 }
 0x1cb   : > { %1427 = vsinq.f32 %v1034_v27 }
 0x1d4   : > { %v1426_v47 = vpop.eup %1425 }
 0x1d5   : > { %v1428_v24 = vpop.eup %1427  ;;  %v1046_v2 = vxor.u32 2147483648, %v1426_v47 }
 0x1d6   : > { %v1043_v15 = vxor.u32 2147483648, %v1428_v24 }
 0x1d7   : > { %v1047_v40 = vsel %vm1045_vm6, %v1046_v2, %v1428_v24 }
 0x1d8   : > { %v1044_v36 = vsel %vm1042_vm7, %v1426_v47, %v1043_v15 }
 0x1d9   : > { %v1048_v22 = vsel %vm1041_vm8, %v1044_v36, %v1047_v40 }
 0x1da   : > { %v1049_v5 = vsel %vm1038_vm9, nan, %v1048_v22 }
 0x1db   : > { %1160 = vst [vmem:[%s1903_s8 + $0x30] sm:$0xff] %v1049_v5 }
 0x1dc   : > { %1443 = shalt.err (!%p1440_p3)
}
 0x1dd   : > { %s1444_s29 = scalar_lea.hbm %s2250_s24, 1024  ;;  %s1448_s5 = scalar_lea.hbm %s2302_s3, 4096 }
 0x1de   : > { %p1445_p4 = scmp.ne.s32.totalorder %s2250_s24, %s1444_s29  ;;  %p1449_p9 = scmp.lt.u32.totalorder %s2250_s24, %s2302_s3 }
 0x1df   : > { %p1450_p10 = scmp.lt.u32.totalorder %s1448_s5, %s1444_s29  ;;  %p1452_p12 = scmp.lt.u32.totalorder %s1444_s29, %s2250_s24 }
 0x1e0   : > { %p1446_p7 = pnand %p1445_p4, %p1561_p5 }
 0x1e1   : > { %p1451_p11 = por %p1450_p10, %p1449_p9 }
 0x1e2   : > { %p1447_p8 = pneg %p1446_p7 }
 0x1e3   : > { %p1453_p13 = por %p1452_p12, %p1451_p11 }
 0x1e5   : > { %p1454_p0 = pnand %p1453_p13, %p1447_p8 }
 0x1e7   : > { %1457 = shalt.err (!%p1454_p0)
}
 0x1e8   : > { %s1501_s8 = smov 128   ;;  %s1502_s9 = smov 8  }
 0x1e9   : > { %1350 = dma.vmem_to_hbm [thread:$0]  (%p1561_p5), %s2252_s17, 1024, %s2250_s24, %s2258_s16, %s1501_s8, %s1501_s8, %s1502_s9  }
 0x1ea PF: > { %p1356_p1 = scmp.ge.s32.totalorder %s1492_s15, 2  ;;  %s1191_s10 = sand.u32 1, %s1480_s12  }
 0x1eb   : > { %s1192_s11 = scalar_lea.sflag [#allocation3], %s1191_s10 }
 0x1ec   : > { %p1353_p2 = pnand %p1356_p1, %p1565_p6 }
 0x1ee   : > { %1475 = dma.done.wait (!%p1353_p2), %s1192_s11, 1024  }
 0x1ef   : > { %1477 = vsyncadd (!%p1353_p2), %s1192_s11, 4294966272  ;;  %p13_p3 = scmp.ge.s32.totalorder %s1548_s18, 6   ;;  %s2317_s12 = smov %s1484_s13 }
 0x1f0   : > { %s2318_s13 = smov %s1488_s14  ;;  %s2319_s14 = smov %s1559_s21 }
 0x1f1   : > { %s2320_s15 = smov %s1548_s18  ;;  %15 = sbr.rel (!%p13_p3) target bundleno = 3 (0x3), region = 67 }
 0x1f8   :  { %1197 = vsyncpa [#allocation3], 1 }
 0x1f9   :  { %1199 = vsyncpa [#allocation3 + $0x1], 1 }

</bundles_post_ra>
